<compile_context>
chip_gen: v6e
topology: v6e:2x2x1
jax: 0.10.0
libtpu: 0.0.40
codegen_flags: <defaults>
</compile_context>

<pallas_src>
import functools
import numpy as np

import jax
import jax.numpy as jnp
from jax import lax
from jax.experimental import pallas as pl
from jax.experimental.pallas import tpu as pltpu

START_TAG = "<START>"
STOP_TAG = "<STOP>"

EMBED_DIM = 16
HIDDEN_DIM = 32
WMAX = 8          # max lattice words STARTING at one character (sublane-friendly padding)

_VMEM = pltpu.MemorySpace.VMEM
_SMEM = pltpu.MemorySpace.SMEM


def _sigmoid(x):
    # numerically-stable sigmoid on the tanh/EUP path (== 1/(1+exp(-x)))
    return 0.5 * (jnp.tanh(0.5 * x) + 1.0)


# ----------------------------- fused Lattice-LSTM kernel -----------------------------

def _lattice_kernel(prefix_ref, nw_ref, vis_ref, cx_ref, wx_ref, ex_ref,
                    w4x_ref, w4h_ref, b4_ref,
                    w3x_ref, w3h_ref, b3_ref,
                    wle_ref, wlc_ref, wlb_ref,
                    h2lw_ref, h2lb_ref, h0_ref, c0_ref,
                    feats_ref,
                    hs_buf, wc_buf, ww_buf):
    T = cx_ref.shape[0]
    H = h0_ref.shape[1]
    WBUF = wc_buf.shape[0]
    wmax = WBUF // T

    # Weights stay resident in VMEM for the whole sequence; hoist loads out of the loop.
    w4x = w4x_ref[...]; w4h = w4h_ref[...]; b4 = b4_ref[...]
    w3x = w3x_ref[...]; w3h = w3h_ref[...]; b3 = b3_ref[...]
    wle = wle_ref[...]; wlc = wlc_ref[...]; wlb = wlb_ref[...]
    vis = vis_ref[...]                                          # (WBUF, 1) int32

    # Word cell-state / weight tables start empty (finite, no NaN garbage).
    wc_buf[...] = jnp.zeros_like(wc_buf)
    ww_buf[...] = jnp.zeros_like(ww_buf)

    rowi = lax.broadcasted_iota(jnp.int32, (wmax, H), 0)
    lane4 = lax.broadcasted_iota(jnp.int32, (1, 4 * H), 1)
    is_tanh4 = (lane4 >= 2 * H) & (lane4 < 3 * H)               # c~ chunk of [f|i|c~|o]
    lane3 = lax.broadcasted_iota(jnp.int32, (wmax, 3 * H), 1)
    is_tanh3 = lane3 >= 2 * H                                   # c~ chunk of [i|f|c~]

    def step(t, carry):
        h, c = carry

        # ---- char LSTM gates: one fused (1,E)x(E,4H) + (1,H)x(H,4H) matmul ----
        x_t = cx_ref[pl.ds(t, 1), :]                            # (1, E)
        g = (jnp.dot(x_t, w4x, preferred_element_type=jnp.float32)
             + jnp.dot(h, w4h, preferred_element_type=jnp.float32) + b4)
        act = jnp.where(is_tanh4, jnp.tanh(g), _sigmoid(g))     # full-vreg activation
        f = act[:, 0:H]
        i = act[:, H:2 * H]
        c_ = act[:, 2 * H:3 * H]
        o = act[:, 3 * H:4 * H]

        # ---- lattice fusion: softmax over [i ; word weights visible at step t] ----
        n = prefix_ref[t]                                       # #words appended before t
        valid = vis <= t                                        # (WBUF, 1)
        wcells = jnp.where(valid, wc_buf[...], 0.0)             # (WBUF, H)
        wts = jnp.where(valid, ww_buf[...], -1e30)
        m = jnp.maximum(jnp.max(wts, axis=0, keepdims=True), i)  # (1, H)
        e_i = jnp.exp(i - m)
        e_w = jnp.exp(wts - m)                                  # invalid rows -> exactly 0
        num = e_i * c_ + jnp.sum(e_w * wcells, axis=0, keepdims=True)
        den = e_i + jnp.sum(e_w, axis=0, keepdims=True)
        c_latt = num / den
        c_plain = f * c + i * c_
        c_new = jnp.where(n > 0, c_latt, c_plain)
        h_new = o * jnp.tanh(c_new)
        hs_buf[pl.ds(t, 1), :] = h_new

        # ---- word LSTM: all words starting at step t in ONE batched matmul ----
        nw_t = nw_ref[t]

        @pl.when(nw_t > 0)
        def _():
            base = pl.multiple_of(t * wmax, wmax)               # aligned per-step region
            wx = wx_ref[pl.ds(base, wmax), :]                   # (wmax, E) word embeds
            ex = ex_ref[pl.ds(base, wmax), :]                   # (wmax, E) end-char embeds
            g3 = (jnp.dot(wx, w3x, preferred_element_type=jnp.float32)
                  + jnp.dot(h_new, w3h, preferred_element_type=jnp.float32) + b3)
            act3 = jnp.where(is_tanh3, jnp.tanh(g3), _sigmoid(g3))
            i3 = act3[:, 0:H]
            f3 = act3[:, H:2 * H]
            c3_ = act3[:, 2 * H:3 * H]
            wcs = f3 * c_new + i3 * c3_                         # (wmax, H)
            ww = _sigmoid(jnp.dot(ex, wle, preferred_element_type=jnp.float32)
                          + jnp.dot(wcs, wlc, preferred_element_type=jnp.float32) + wlb)
            keep = rowi < nw_t                                  # only the real word slots
            wc_buf[pl.ds(base, wmax), :] = jnp.where(keep, wcs,
                                                     wc_buf[pl.ds(base, wmax), :])
            ww_buf[pl.ds(base, wmax), :] = jnp.where(keep, ww,
                                                     ww_buf[pl.ds(base, wmax), :])

        return h_new, c_new

    lax.fori_loop(0, T, step, (h0_ref[...], c0_ref[...]))

    # ---- hidden2label epilogue fused into the same kernel: (T,H)x(H,L) ----
    feats_ref[...] = (jnp.dot(hs_buf[...], h2lw_ref[...],
                              preferred_element_type=jnp.float32) + h2lb_ref[...])


@jax.jit
def lattice_forward(prefix, nw, visible_from, char_x, word_x, end_x,
                    w4x, w4h, b4, w3x, w3h, b3, wle, wlc, wlb,
                    h2lw, h2lb, h0, c0):
    T = char_x.shape[0]
    H = h0.shape[1]
    L = h2lw.shape[1]
    wmax = word_x.shape[0] // T
    return pl.pallas_call(
        _lattice_kernel,
        out_shape=jax.ShapeDtypeStruct((T, L), jnp.float32),
        in_specs=([pl.BlockSpec(memory_space=_SMEM)] * 2
                  + [pl.BlockSpec(memory_space=_VMEM)] * 17),
        out_specs=pl.BlockSpec(memory_space=_VMEM),
        scratch_shapes=[pltpu.VMEM((T, H), jnp.float32),          # hidden states
                        pltpu.VMEM((T * wmax, H), jnp.float32),   # word cell states
                        pltpu.VMEM((T * wmax, H), jnp.float32)],  # word weights
    )(prefix, nw, visible_from, char_x, word_x, end_x,
      w4x, w4h, b4, w3x, w3h, b3, wle, wlc, wlb, h2lw, h2lb, h0, c0)


# ----------------------------- fused Viterbi DP kernel -----------------------------

def _make_viterbi_kernel(start_idx):
    def kernel(feats_ref, trans_t_ref, bt_ref, alpha_ref):
        T, L = feats_ref.shape
        trans_t = trans_t_ref[...]
        rowi = lax.broadcasted_iota(jnp.int32, (L, L), 0)
        coli = lax.broadcasted_iota(jnp.int32, (L, L), 1)
        lane = lax.broadcasted_iota(jnp.int32, (1, L), 1)
        alpha0 = jnp.where(lane == start_idx, 0.0, -10000.0).astype(jnp.float32)

        def body(t, alpha):
            frame = feats_ref[pl.ds(t, 1), :]                    # (1, L)
            # alpha as a column via a masked diag-sum (avoids a tiny transpose relayout)
            alpha_col = jnp.sum(jnp.where(rowi == coli,
                                          jnp.broadcast_to(alpha, (L, L)), 0.0),
                                axis=1, keepdims=True)           # (L, 1)
            smat = alpha_col + frame + trans_t                   # smat[prev, cur]
            val = jnp.max(smat, axis=0, keepdims=True)           # (1, L)
            idx = jnp.min(jnp.where(smat == val, rowi, L),
                          axis=0, keepdims=True)                 # first argmax
            bt_ref[pl.ds(t, 1), :] = idx.astype(jnp.int32)
            return val

        alpha_ref[...] = lax.fori_loop(0, T, body, alpha0)
    return kernel


@functools.partial(jax.jit, static_argnames=("start_idx",))
def viterbi_forward(feats, trans_t, start_idx):
    T, L = feats.shape
    return pl.pallas_call(
        _make_viterbi_kernel(start_idx),
        out_shape=(jax.ShapeDtypeStruct((T, L), jnp.int32),       # backtrace
                   jax.ShapeDtypeStruct((1, L), jnp.float32)),    # final alpha
        in_specs=[pl.BlockSpec(memory_space=_VMEM)] * 2,
        out_specs=(pl.BlockSpec(memory_space=_VMEM),
                   pl.BlockSpec(memory_space=_VMEM)),
    )(feats, trans_t)


# ----------------------------- model glue -----------------------------

class LatticeLSTMPallas:
    def __init__(self, character_size, word_size, label2idx, embed_dim, hidden_dim, key):
        self.label2idx = label2idx
        self.label_size = len(label2idx)
        self.embed_dim = embed_dim
        self.hidden_dim = hidden_dim
        E, H, L = embed_dim, hidden_dim, self.label_size
        ks = jax.random.split(key, 16)
        s = 0.1
        f32 = jnp.float32
        self.char_embeds = jax.random.normal(ks[0], (character_size, E), f32) * s
        self.word_embeds = jax.random.normal(ks[1], (word_size, E), f32) * s
        # CharLSTM gates, stacked columns [f | i | c~ | o]; split into embed / hidden parts
        self.char_w4x = jax.random.normal(ks[2], (E, 4 * H), f32) * s
        self.char_w4h = jax.random.normal(ks[3], (H, 4 * H), f32) * s
        self.char_b4 = jax.random.normal(ks[4], (1, 4 * H), f32) * s
        # WordLSTM gates, stacked columns [i | f | c~]
        self.word_w3x = jax.random.normal(ks[5], (E, 3 * H), f32) * s
        self.word_w3h = jax.random.normal(ks[6], (H, 3 * H), f32) * s
        self.word_b3 = jax.random.normal(ks[7], (1, 3 * H), f32) * s
        # w_l split into end-char-embed part and cell-state part
        self.wl_e = jax.random.normal(ks[8], (E, H), f32) * s
        self.wl_c = jax.random.normal(ks[9], (H, H), f32) * s
        self.wl_b = jax.random.normal(ks[10], (1, H), f32) * s
        # hidden2label
        self.h2l_w = jax.random.normal(ks[11], (H, L), f32) * s
        self.h2l_b = jax.random.normal(ks[12], (1, L), f32) * s
        # CRF transitions[to, from]
        trans = jax.random.normal(ks[13], (L, L), f32)
        trans = trans.at[label2idx[START_TAG], :].set(-10000.0)
        trans = trans.at[:, label2idx[STOP_TAG]].set(-10000.0)
        self.transitions = trans
        # deterministic init_hidden()
        self.h0 = jax.random.normal(ks[14], (1, H), f32)
        self.c0 = jax.random.normal(ks[15], (1, H), f32)

    def get_lstm_features(self, input_ids, input_words):
        T = len(input_ids)
        # -------- host-side lattice schedule packing (numpy, once per sequence) --------
        # Mirrors the reference `words_cell_states = [[]] * length` aliasing: a word cell
        # computed at step t is visible to EVERY char step > t (order is irrelevant for
        # the softmax fusion, so each step gets its own aligned WMAX-row buffer region).
        nw = np.zeros((T,), np.int32)                 # words starting at step t
        prefix = np.zeros((T,), np.int32)             # words appended before step t
        word_ids = np.zeros((T * WMAX,), np.int32)
        end_ids = np.zeros((T * WMAX,), np.int32)
        visible_from = np.full((T * WMAX, 1), T + 1, np.int32)   # padding: never visible
        cnt = 0
        for t in range(T):
            prefix[t] = cnt
            ws = input_words[t] if input_words[t] else []
            assert len(ws) <= WMAX, "increase WMAX"
            nw[t] = len(ws)
            for j, (wid, wlen) in enumerate(ws):
                word_ids[t * WMAX + j] = wid
                end_ids[t * WMAX + j] = input_ids[t + wlen - 1]
                visible_from[t * WMAX + j, 0] = t + 1
            cnt += len(ws)
        # -------- device-side embedding gathers (single XLA ops, off the hot loop) -----
        char_x = jnp.take(self.char_embeds, jnp.asarray(input_ids, jnp.int32), axis=0)
        word_x = jnp.take(self.word_embeds, jnp.asarray(word_ids, jnp.int32), axis=0)
        end_x = jnp.take(self.char_embeds, jnp.asarray(end_ids, jnp.int32), axis=0)
        return lattice_forward(
            jnp.asarray(prefix), jnp.asarray(nw), jnp.asarray(visible_from),
            char_x, word_x, end_x,
            self.char_w4x, self.char_w4h, self.char_b4,
            self.word_w3x, self.word_w3h, self.word_b3,
            self.wl_e, self.wl_c, self.wl_b,
            self.h2l_w, self.h2l_b, self.h0, self.c0)

    def viterbi_decode(self, lstm_feats):
        trans_t = self.transitions.T
        bt, alpha = viterbi_forward(lstm_feats, trans_t, self.label2idx[START_TAG])
        backtrace = np.asarray(jax.device_get(bt))                # (T, L)
        alpha = np.asarray(jax.device_get(alpha))                 # (1, L)
        trans = np.asarray(jax.device_get(self.transitions))
        stop = self.label2idx[STOP_TAG]
        smat = alpha.T + trans[[stop], :].T                       # (L, 1)
        best_tag_id = int(np.argmax(smat[:, 0]))
        val = float(smat[best_tag_id, 0])
        best_path = [best_tag_id]
        # TODO(synk): the data-dependent backtracking walk stays on host (tiny Python loop).
        for bptrs_t in reversed(list(backtrace[1:])):
            best_tag_id = int(bptrs_t[best_tag_id])
            best_path.append(best_tag_id)
        return val, best_path[::-1]

    def __call__(self, input_ids, input_words):
        lstm_feats = self.get_lstm_features(input_ids, input_words)
        return self.viterbi_decode(lstm_feats)


# ----------------------------- demo -----------------------------

if __name__ == "__main__":
    label2idx = {"B": 0, "I": 1, "O": 2, START_TAG: 3, STOP_TAG: 4}
    model = LatticeLSTMPallas(character_size=20, word_size=10, label2idx=label2idx,
                              embed_dim=EMBED_DIM, hidden_dim=HIDDEN_DIM,
                              key=jax.random.PRNGKey(0))
    # sequence of 8 characters; lattice words given as [word_id, word_length]
    input_ids = [3, 7, 1, 9, 4, 2, 8, 5]
    input_words = [
        [[2, 3]],            # word over chars 0..2
        [],
        [[5, 2], [7, 4]],    # words over chars 2..3 and 2..5
        [],
        [],
        [[1, 3]],            # word over chars 5..7
        [],
        [],
    ]
    feats = model.get_lstm_features(input_ids, input_words)
    jax.block_until_ready(feats)
    score, path = model(input_ids, input_words)
    assert feats.shape == (len(input_ids), len(label2idx))
    assert len(path) == len(input_ids)
    assert np.isfinite(score)
    assert np.all(np.isfinite(np.asarray(feats)))
    print("KERNEL_OK")
</pallas_src>

<mosaic_0001>
module attributes {stable_mosaic.version = 11 : i64} {
  func.func @_lattice_kernel(%arg0: memref<8xi32, #tpu.memory_space<smem>>, %arg1: memref<8xi32, #tpu.memory_space<smem>>, %arg2: memref<64x1xi32, #tpu.memory_space<vmem>>, %arg3: memref<8x16xf32, #tpu.memory_space<vmem>>, %arg4: memref<64x16xf32, #tpu.memory_space<vmem>>, %arg5: memref<64x16xf32, #tpu.memory_space<vmem>>, %arg6: memref<16x128xf32, #tpu.memory_space<vmem>>, %arg7: memref<32x128xf32, #tpu.memory_space<vmem>>, %arg8: memref<1x128xf32, #tpu.memory_space<vmem>>, %arg9: memref<16x96xf32, #tpu.memory_space<vmem>>, %arg10: memref<32x96xf32, #tpu.memory_space<vmem>>, %arg11: memref<1x96xf32, #tpu.memory_space<vmem>>, %arg12: memref<16x32xf32, #tpu.memory_space<vmem>>, %arg13: memref<32x32xf32, #tpu.memory_space<vmem>>, %arg14: memref<1x32xf32, #tpu.memory_space<vmem>>, %arg15: memref<32x5xf32, #tpu.memory_space<vmem>>, %arg16: memref<1x5xf32, #tpu.memory_space<vmem>>, %arg17: memref<1x32xf32, #tpu.memory_space<vmem>>, %arg18: memref<1x32xf32, #tpu.memory_space<vmem>>, %arg19: memref<8x5xf32, #tpu.memory_space<vmem>>, %arg20: memref<8x32xf32, #tpu.memory_space<vmem>>, %arg21: memref<64x32xf32, #tpu.memory_space<vmem>>, %arg22: memref<64x32xf32, #tpu.memory_space<vmem>>) attributes {dimension_semantics = [], scalar_prefetch = 0 : i64, scratch_operands = 3 : i64, tpu.core_type = #tpu.core_type<tc>} {
    %c0 = arith.constant 0 : index
    %c0_0 = arith.constant 0 : index
    %0 = vector.load %arg6[%c0, %c0_0] : memref<16x128xf32, #tpu.memory_space<vmem>>, vector<16x128xf32>
    %c0_1 = arith.constant 0 : index
    %c0_2 = arith.constant 0 : index
    %1 = vector.load %arg7[%c0_1, %c0_2] : memref<32x128xf32, #tpu.memory_space<vmem>>, vector<32x128xf32>
    %c0_3 = arith.constant 0 : index
    %c0_4 = arith.constant 0 : index
    %2 = vector.load %arg8[%c0_3, %c0_4] : memref<1x128xf32, #tpu.memory_space<vmem>>, vector<1x128xf32>
    %c0_5 = arith.constant 0 : index
    %c0_6 = arith.constant 0 : index
    %3 = vector.load %arg9[%c0_5, %c0_6] : memref<16x96xf32, #tpu.memory_space<vmem>>, vector<16x96xf32>
    %c0_7 = arith.constant 0 : index
    %c0_8 = arith.constant 0 : index
    %4 = vector.load %arg10[%c0_7, %c0_8] : memref<32x96xf32, #tpu.memory_space<vmem>>, vector<32x96xf32>
    %c0_9 = arith.constant 0 : index
    %c0_10 = arith.constant 0 : index
    %5 = vector.load %arg11[%c0_9, %c0_10] : memref<1x96xf32, #tpu.memory_space<vmem>>, vector<1x96xf32>
    %c0_11 = arith.constant 0 : index
    %c0_12 = arith.constant 0 : index
    %6 = vector.load %arg12[%c0_11, %c0_12] : memref<16x32xf32, #tpu.memory_space<vmem>>, vector<16x32xf32>
    %c0_13 = arith.constant 0 : index
    %c0_14 = arith.constant 0 : index
    %7 = vector.load %arg13[%c0_13, %c0_14] : memref<32x32xf32, #tpu.memory_space<vmem>>, vector<32x32xf32>
    %c0_15 = arith.constant 0 : index
    %c0_16 = arith.constant 0 : index
    %8 = vector.load %arg14[%c0_15, %c0_16] : memref<1x32xf32, #tpu.memory_space<vmem>>, vector<1x32xf32>
    %c0_17 = arith.constant 0 : index
    %c0_18 = arith.constant 0 : index
    %9 = vector.load %arg2[%c0_17, %c0_18] : memref<64x1xi32, #tpu.memory_space<vmem>>, vector<64x1xi32>
    %cst = arith.constant 0.000000e+00 : f32
    %10 = vector.broadcast %cst : f32 to vector<64x32xf32>
    %c0_19 = arith.constant 0 : index
    %c0_20 = arith.constant 0 : index
    %11 = vector.load %arg21[%c0_19, %c0_20] : memref<64x32xf32, #tpu.memory_space<vmem>>, vector<64x32xf32>
    tpu.vector_store %arg21[%c0_19, %c0_20], %10 {strides = array<i32>} : memref<64x32xf32, #tpu.memory_space<vmem>>, vector<64x32xf32>,
    %cst_21 = arith.constant 0.000000e+00 : f32
    %12 = vector.broadcast %cst_21 : f32 to vector<64x32xf32>
    %c0_22 = arith.constant 0 : index
    %c0_23 = arith.constant 0 : index
    %13 = vector.load %arg22[%c0_22, %c0_23] : memref<64x32xf32, #tpu.memory_space<vmem>>, vector<64x32xf32>
    tpu.vector_store %arg22[%c0_22, %c0_23], %12 {strides = array<i32>} : memref<64x32xf32, #tpu.memory_space<vmem>>, vector<64x32xf32>,
    %14 = tpu.iota {dimensions = array<i32: 0>} : vector<8x32xi32>
    %15 = tpu.iota {dimensions = array<i32: 1>} : vector<1x128xi32>
    %c64_i32 = arith.constant 64 : i32
    %16 = vector.broadcast %c64_i32 : i32 to vector<1x128xi32>
    %17 = arith.cmpi sge, %15, %16 : vector<1x128xi32>
    %c96_i32 = arith.constant 96 : i32
    %18 = vector.broadcast %c96_i32 : i32 to vector<1x128xi32>
    %19 = arith.cmpi slt, %15, %18 : vector<1x128xi32>
    %20 = arith.andi %17, %19 : vector<1x128xi1>
    %21 = tpu.iota {dimensions = array<i32: 1>} : vector<8x96xi32>
    %c64_i32_24 = arith.constant 64 : i32
    %22 = vector.broadcast %c64_i32_24 : i32 to vector<8x96xi32>
    %23 = arith.cmpi sge, %21, %22 : vector<8x96xi32>
    %c0_25 = arith.constant 0 : index
    %c0_26 = arith.constant 0 : index
    %24 = vector.load %arg17[%c0_25, %c0_26] : memref<1x32xf32, #tpu.memory_space<vmem>>, vector<1x32xf32>
    %c0_27 = arith.constant 0 : index
    %c0_28 = arith.constant 0 : index
    %25 = vector.load %arg18[%c0_27, %c0_28] : memref<1x32xf32, #tpu.memory_space<vmem>>, vector<1x32xf32>
    %c0_i32 = arith.constant 0 : i32
    %c8_i32 = arith.constant 8 : i32
    %26 = arith.addi %c0_i32, %c8_i32 : i32
    %c1_i32 = arith.constant 1 : i32
    %27:2 = scf.for %arg23 = %c0_i32 to %26 step %c1_i32 iter_args(%arg24 = %24, %arg25 = %25) -> (vector<1x32xf32>, vector<1x32xf32>)  : i32 {
      %35 = arith.index_cast %arg23 : i32 to index
      %c0_39 = arith.constant 0 : index
      %36 = vector.load %arg3[%35, %c0_39] : memref<8x16xf32, #tpu.memory_space<vmem>>, vector<1x16xf32>
      %cst_40 = arith.constant dense<0.000000e+00> : vector<1x128xf32>
      %37 = tpu.matmul %36, %0, %cst_40 {dimension_numbers = #tpu.dot_dimension_numbers<[1], [0], [0], [1], [0, 0, 1, 1], [], []>} : vector<1x16xf32>, vector<16x128xf32>, vector<1x128xf32> -> vector<1x128xf32>
      %cst_41 = arith.constant dense<0.000000e+00> : vector<1x128xf32>
      %38 = tpu.matmul %arg24, %1, %cst_41 {dimension_numbers = #tpu.dot_dimension_numbers<[1], [0], [0], [1], [0, 0, 1, 1], [], []>} : vector<1x32xf32>, vector<32x128xf32>, vector<1x128xf32> -> vector<1x128xf32>
      %39 = arith.addf %37, %38 : vector<1x128xf32>
      %40 = arith.addf %39, %2 : vector<1x128xf32>
      %41 = math.tanh %40 : vector<1x128xf32>
      %cst_42 = arith.constant 5.000000e-01 : f32
      %42 = vector.broadcast %cst_42 : f32 to vector<1x128xf32>
      %43 = arith.mulf %42, %40 : vector<1x128xf32>
      %44 = math.tanh %43 : vector<1x128xf32>
      %cst_43 = arith.constant 1.000000e+00 : f32
      %45 = vector.broadcast %cst_43 : f32 to vector<1x128xf32>
      %46 = arith.addf %44, %45 : vector<1x128xf32>
      %cst_44 = arith.constant 5.000000e-01 : f32
      %47 = vector.broadcast %cst_44 : f32 to vector<1x128xf32>
      %48 = arith.mulf %47, %46 : vector<1x128xf32>
      %49 = arith.select %20, %41, %48 : vector<1x128xi1>, vector<1x128xf32>
      %50 = vector.extract_strided_slice %49 {offsets = [0, 0], sizes = [1, 32], strides = [1, 1]} : vector<1x128xf32> to vector<1x32xf32>
      %51 = vector.extract_strided_slice %49 {offsets = [0, 32], sizes = [1, 32], strides = [1, 1]} : vector<1x128xf32> to vector<1x32xf32>
      %52 = vector.extract_strided_slice %49 {offsets = [0, 64], sizes = [1, 32], strides = [1, 1]} : vector<1x128xf32> to vector<1x32xf32>
      %53 = vector.extract_strided_slice %49 {offsets = [0, 96], sizes = [1, 32], strides = [1, 1]} : vector<1x128xf32> to vector<1x32xf32>
      %54 = arith.index_cast %arg23 : i32 to index
      %55 = memref.load %arg0[%54] : memref<8xi32, #tpu.memory_space<smem>>
      %56 = vector.broadcast %arg23 : i32 to vector<64x1xi32>
      %57 = arith.cmpi sle, %9, %56 : vector<64x1xi32>
      %c0_45 = arith.constant 0 : index
      %c0_46 = arith.constant 0 : index
      %58 = vector.load %arg21[%c0_45, %c0_46] : memref<64x32xf32, #tpu.memory_space<vmem>>, vector<64x32xf32>
      %cst_47 = arith.constant 0.000000e+00 : f32
      %59 = vector.shape_cast %57 : vector<64x1xi1> to vector<64x1xi1>
      %60 = vector.broadcast %59 : vector<64x1xi1> to vector<64x32xi1>
      %61 = vector.broadcast %cst_47 : f32 to vector<64x32xf32>
      %62 = arith.select %60, %58, %61 : vector<64x32xi1>, vector<64x32xf32>
      %c0_48 = arith.constant 0 : index
      %c0_49 = arith.constant 0 : index
      %63 = vector.load %arg22[%c0_48, %c0_49] : memref<64x32xf32, #tpu.memory_space<vmem>>, vector<64x32xf32>
      %cst_50 = arith.constant -1.000000e+30 : f32
      %64 = vector.shape_cast %57 : vector<64x1xi1> to vector<64x1xi1>
      %65 = vector.broadcast %64 : vector<64x1xi1> to vector<64x32xi1>
      %66 = vector.broadcast %cst_50 : f32 to vector<64x32xf32>
      %67 = arith.select %65, %63, %66 : vector<64x32xi1>, vector<64x32xf32>
      %cst_51 = arith.constant dense<0xFF800000> : vector<32xf32>
      %68 = vector.multi_reduction <maximumf>, %67, %cst_51 [0] : vector<64x32xf32> to vector<32xf32>
      %69 = vector.shape_cast %68 : vector<32xf32> to vector<1x32xf32>
      %70 = arith.maximumf %69, %51 : vector<1x32xf32>
      %71 = arith.subf %51, %70 : vector<1x32xf32>
      %72 = math.exp %71 : vector<1x32xf32>
      %73 = vector.broadcast %70 : vector<1x32xf32> to vector<64x32xf32>
      %74 = arith.subf %67, %73 : vector<64x32xf32>
      %75 = math.exp %74 : vector<64x32xf32>
      %76 = arith.mulf %72, %52 : vector<1x32xf32>
      %77 = arith.mulf %75, %62 : vector<64x32xf32>
      %cst_52 = arith.constant dense<0.000000e+00> : vector<32xf32>
      %78 = vector.multi_reduction <add>, %77, %cst_52 [0] : vector<64x32xf32> to vector<32xf32>
      %79 = vector.shape_cast %78 : vector<32xf32> to vector<1x32xf32>
      %80 = arith.addf %76, %79 : vector<1x32xf32>
      %cst_53 = arith.constant dense<0.000000e+00> : vector<32xf32>
      %81 = vector.multi_reduction <add>, %75, %cst_53 [0] : vector<64x32xf32> to vector<32xf32>
      %82 = vector.shape_cast %81 : vector<32xf32> to vector<1x32xf32>
      %83 = arith.addf %72, %82 : vector<1x32xf32>
      %84 = arith.divf %80, %83 : vector<1x32xf32>
      %85 = arith.mulf %50, %arg25 : vector<1x32xf32>
      %86 = arith.mulf %51, %52 : vector<1x32xf32>
      %87 = arith.addf %85, %86 : vector<1x32xf32>
      %c0_i32_54 = arith.constant 0 : i32
      %88 = arith.cmpi sgt, %55, %c0_i32_54 : i32
      %89 = arith.select %88, %84, %87 : vector<1x32xf32>
      %90 = math.tanh %89 : vector<1x32xf32>
      %91 = arith.mulf %53, %90 : vector<1x32xf32>
      %92 = arith.index_cast %arg23 : i32 to index
      %c0_55 = arith.constant 0 : index
      %93 = vector.load %arg20[%92, %c0_55] : memref<8x32xf32, #tpu.memory_space<vmem>>, vector<1x32xf32>
      tpu.vector_store %arg20[%92, %c0_55], %91 {strides = array<i32>} : memref<8x32xf32, #tpu.memory_space<vmem>>, vector<1x32xf32>,
      %94 = arith.index_cast %arg23 : i32 to index
      %95 = memref.load %arg1[%94] : memref<8xi32, #tpu.memory_space<smem>>
      %c0_i32_56 = arith.constant 0 : i32
      %96 = arith.cmpi sgt, %95, %c0_i32_56 : i32
      %97 = arith.extui %96 : i1 to i32
      %c0_i32_57 = arith.constant 0 : i32
      %98 = arith.cmpi ne, %97, %c0_i32_57 : i32
      scf.if %98 {
        %c8_i32_58 = arith.constant 8 : i32
        %99 = arith.muli %arg23, %c8_i32_58 : i32
        %100 = tpu.assume_multiple %99, 8 : i32
        %101 = arith.index_cast %100 : i32 to index
        %c0_59 = arith.constant 0 : index
        %102 = vector.load %arg4[%101, %c0_59] : memref<64x16xf32, #tpu.memory_space<vmem>>, vector<8x16xf32>
        %103 = arith.index_cast %100 : i32 to index
        %c0_60 = arith.constant 0 : index
        %104 = vector.load %arg5[%103, %c0_60] : memref<64x16xf32, #tpu.memory_space<vmem>>, vector<8x16xf32>
        %cst_61 = arith.constant dense<0.000000e+00> : vector<8x96xf32>
        %105 = tpu.matmul %102, %3, %cst_61 {dimension_numbers = #tpu.dot_dimension_numbers<[1], [0], [0], [1], [0, 0, 1, 1], [], []>} : vector<8x16xf32>, vector<16x96xf32>, vector<8x96xf32> -> vector<8x96xf32>
        %cst_62 = arith.constant dense<0.000000e+00> : vector<1x96xf32>
        %106 = tpu.matmul %91, %4, %cst_62 {dimension_numbers = #tpu.dot_dimension_numbers<[1], [0], [0], [1], [0, 0, 1, 1], [], []>} : vector<1x32xf32>, vector<32x96xf32>, vector<1x96xf32> -> vector<1x96xf32>
        %107 = vector.broadcast %106 : vector<1x96xf32> to vector<8x96xf32>
        %108 = arith.addf %105, %107 : vector<8x96xf32>
        %109 = vector.broadcast %5 : vector<1x96xf32> to vector<8x96xf32>
        %110 = arith.addf %108, %109 : vector<8x96xf32>
        %111 = math.tanh %110 : vector<8x96xf32>
        %cst_63 = arith.constant 5.000000e-01 : f32
        %112 = vector.broadcast %cst_63 : f32 to vector<8x96xf32>
        %113 = arith.mulf %112, %110 : vector<8x96xf32>
        %114 = math.tanh %113 : vector<8x96xf32>
        %cst_64 = arith.constant 1.000000e+00 : f32
        %115 = vector.broadcast %cst_64 : f32 to vector<8x96xf32>
        %116 = arith.addf %114, %115 : vector<8x96xf32>
        %cst_65 = arith.constant 5.000000e-01 : f32
        %117 = vector.broadcast %cst_65 : f32 to vector<8x96xf32>
        %118 = arith.mulf %117, %116 : vector<8x96xf32>
        %119 = arith.select %23, %111, %118 : vector<8x96xi1>, vector<8x96xf32>
        %120 = vector.extract_strided_slice %119 {offsets = [0, 0], sizes = [8, 32], strides = [1, 1]} : vector<8x96xf32> to vector<8x32xf32>
        %121 = vector.extract_strided_slice %119 {offsets = [0, 32], sizes = [8, 32], strides = [1, 1]} : vector<8x96xf32> to vector<8x32xf32>
        %122 = vector.extract_strided_slice %119 {offsets = [0, 64], sizes = [8, 32], strides = [1, 1]} : vector<8x96xf32> to vector<8x32xf32>
        %123 = vector.broadcast %89 : vector<1x32xf32> to vector<8x32xf32>
        %124 = arith.mulf %121, %123 : vector<8x32xf32>
        %125 = arith.mulf %120, %122 : vector<8x32xf32>
        %126 = arith.addf %124, %125 : vector<8x32xf32>
        %cst_66 = arith.constant dense<0.000000e+00> : vector<8x32xf32>
        %127 = tpu.matmul %104, %6, %cst_66 {dimension_numbers = #tpu.dot_dimension_numbers<[1], [0], [0], [1], [0, 0, 1, 1], [], []>} : vector<8x16xf32>, vector<16x32xf32>, vector<8x32xf32> -> vector<8x32xf32>
        %cst_67 = arith.constant dense<0.000000e+00> : vector<8x32xf32>
        %128 = tpu.matmul %126, %7, %cst_67 {dimension_numbers = #tpu.dot_dimension_numbers<[1], [0], [0], [1], [0, 0, 1, 1], [], []>} : vector<8x32xf32>, vector<32x32xf32>, vector<8x32xf32> -> vector<8x32xf32>
        %129 = arith.addf %127, %128 : vector<8x32xf32>
        %130 = vector.broadcast %8 : vector<1x32xf32> to vector<8x32xf32>
        %131 = arith.addf %129, %130 : vector<8x32xf32>
        %cst_68 = arith.constant 5.000000e-01 : f32
        %132 = vector.broadcast %cst_68 : f32 to vector<8x32xf32>
        %133 = arith.mulf %132, %131 : vector<8x32xf32>
        %134 = math.tanh %133 : vector<8x32xf32>
        %cst_69 = arith.constant 1.000000e+00 : f32
        %135 = vector.broadcast %cst_69 : f32 to vector<8x32xf32>
        %136 = arith.addf %134, %135 : vector<8x32xf32>
        %cst_70 = arith.constant 5.000000e-01 : f32
        %137 = vector.broadcast %cst_70 : f32 to vector<8x32xf32>
        %138 = arith.mulf %137, %136 : vector<8x32xf32>
        %139 = vector.broadcast %95 : i32 to vector<8x32xi32>
        %140 = arith.cmpi slt, %14, %139 : vector<8x32xi32>
        %141 = arith.index_cast %100 : i32 to index
        %c0_71 = arith.constant 0 : index
        %142 = vector.load %arg21[%141, %c0_71] : memref<64x32xf32, #tpu.memory_space<vmem>>, vector<8x32xf32>
        %143 = arith.select %140, %126, %142 : vector<8x32xi1>, vector<8x32xf32>
        %144 = arith.index_cast %100 : i32 to index
        %c0_72 = arith.constant 0 : index
        %145 = vector.load %arg21[%144, %c0_72] : memref<64x32xf32, #tpu.memory_space<vmem>>, vector<8x32xf32>
        tpu.vector_store %arg21[%144, %c0_72], %143 {strides = array<i32>} : memref<64x32xf32, #tpu.memory_space<vmem>>, vector<8x32xf32>,
        %146 = arith.index_cast %100 : i32 to index
        %c0_73 = arith.constant 0 : index
        %147 = vector.load %arg22[%146, %c0_73] : memref<64x32xf32, #tpu.memory_space<vmem>>, vector<8x32xf32>
        %148 = arith.select %140, %138, %147 : vector<8x32xi1>, vector<8x32xf32>
        %149 = arith.index_cast %100 : i32 to index
        %c0_74 = arith.constant 0 : index
        %150 = vector.load %arg22[%149, %c0_74] : memref<64x32xf32, #tpu.memory_space<vmem>>, vector<8x32xf32>
        tpu.vector_store %arg22[%149, %c0_74], %148 {strides = array<i32>} : memref<64x32xf32, #tpu.memory_space<vmem>>, vector<8x32xf32>,
      } else {
      }
      scf.yield %91, %89 : vector<1x32xf32>, vector<1x32xf32>
    }
    %c8_i32_29 = arith.constant 8 : i32
    %c0_30 = arith.constant 0 : index
    %c0_31 = arith.constant 0 : index
    %28 = vector.load %arg20[%c0_30, %c0_31] : memref<8x32xf32, #tpu.memory_space<vmem>>, vector<8x32xf32>
    %c0_32 = arith.constant 0 : index
    %c0_33 = arith.constant 0 : index
    %29 = vector.load %arg15[%c0_32, %c0_33] : memref<32x5xf32, #tpu.memory_space<vmem>>, vector<32x5xf32>
    %cst_34 = arith.constant dense<0.000000e+00> : vector<8x5xf32>
    %30 = tpu.matmul %28, %29, %cst_34 {dimension_numbers = #tpu.dot_dimension_numbers<[1], [0], [0], [1], [0, 0, 1, 1], [], []>} : vector<8x32xf32>, vector<32x5xf32>, vector<8x5xf32> -> vector<8x5xf32>
    %c0_35 = arith.constant 0 : index
    %c0_36 = arith.constant 0 : index
    %31 = vector.load %arg16[%c0_35, %c0_36] : memref<1x5xf32, #tpu.memory_space<vmem>>, vector<1x5xf32>
    %32 = vector.broadcast %31 : vector<1x5xf32> to vector<8x5xf32>
    %33 = arith.addf %30, %32 : vector<8x5xf32>
    %c0_37 = arith.constant 0 : index
    %c0_38 = arith.constant 0 : index
    %34 = vector.load %arg19[%c0_37, %c0_38] : memref<8x5xf32, #tpu.memory_space<vmem>>, vector<8x5xf32>
    tpu.vector_store %arg19[%c0_37, %c0_38], %33 {strides = array<i32>} : memref<8x5xf32, #tpu.memory_space<vmem>>, vector<8x5xf32>,
    return
  }
}

</mosaic_0001>

<bundles_post_ra>
// kernel: lattice_forward.1
= control target key start
LH: loop header
LB: loop body
LE: loop exit
PB: predicated region body
PF: predicated region fallthrough
CT: control target
= control target key end

     0   :  { %s1845_s0 = inlined_call_operand.vmem [shape: s32[8], index: 0, kind: input, shape index: {}]   ;;  %s1846_s1 = inlined_call_operand.vmem [shape: s32[8], index: 1, kind: input, shape index: {}]   ;;  %s1847_s2 = inlined_call_operand.vmem [shape: s32[64,1], index: 2, kind: input, shape index: {}]   ;;  %s1848_s3 = inlined_call_operand.vmem [shape: f32[8,16], index: 3, kind: input, shape index: {}]   ;;  %s1849_s4 = inlined_call_operand.vmem [shape: f32[64,16], index: 4, kind: input, shape index: {}]   ;;  %s1850_s5 = inlined_call_operand.vmem [shape: f32[64,16], index: 5, kind: input, shape index: {}]   ;;  %s1851_s6 = inlined_call_operand.vmem [shape: f32[16,128], index: 6, kind: input, shape index: {}]   ;;  %s1852_s7 = inlined_call_operand.vmem [shape: f32[32,128], index: 7, kind: input, shape index: {}]   ;;  %s1853_s8 = inlined_call_operand.vmem [shape: f32[1,128], index: 8, kind: input, shape index: {}]   ;;  %s1854_s9 = inlined_call_operand.vmem [shape: f32[16,96], index: 9, kind: input, shape index: {}]   ;;  %s1855_s10 = inlined_call_operand.vmem [shape: f32[32,96], index: 10, kind: input, shape index: {}]   ;;  %s1856_s11 = inlined_call_operand.vmem [shape: f32[1,96], index: 11, kind: input, shape index: {}]   ;;  %s1857_s12 = inlined_call_operand.vmem [shape: f32[16,32], index: 12, kind: input, shape index: {}]   ;;  %s1858_s13 = inlined_call_operand.vmem [shape: f32[32,32], index: 13, kind: input, shape index: {}]   ;;  %s1859_s14 = inlined_call_operand.vmem [shape: f32[1,32], index: 14, kind: input, shape index: {}]   ;;  %s1860_s15 = inlined_call_operand.vmem [shape: f32[32,5], index: 15, kind: input, shape index: {}]   ;;  %s1861_s16 = inlined_call_operand.vmem [shape: f32[1,5], index: 16, kind: input, shape index: {}]   ;;  %s1862_s17 = inlined_call_operand.vmem [shape: f32[1,32], index: 17, kind: input, shape index: {}]   ;;  %s1863_s18 = inlined_call_operand.vmem [shape: f32[1,32], index: 18, kind: input, shape index: {}]   ;;  %s1864_s19 = inlined_call_operand.hbm [shape: f32[8,5], index: 19, kind: output, shape index: {}]  }
   0x1   :  { %1868 = sst [smem:[#allocation24_spill]] %s1845_s0 }
   0x2   :  { %1869 = sst [smem:[#allocation25_spill]] %s1846_s1 }
   0x3   :  { %1870 = sst [smem:[#allocation26_spill]] %s1847_s2 }
   0x4   :  { %1871 = sst [smem:[#allocation27_spill]] %s1848_s3 }
   0x5   :  { %24 = vsyncpa [#allocation7], 0 }
   0x6   :  { %25 = vsyncpa [#allocation9], 0 }
   0x7   :  { %26 = vsyncpa [#allocation6], 0  ;;  %s1872_s20 = sld [smem:[#allocation24_spill]] }
   0x8   :  { %s1873_s2 = sld [smem:[#allocation25_spill]] }
   0xd   :  { %s33_s21 = sshll.u32 %s1872_s20, 4  ;;  %s34_s21 = int_to_ptr.vmem [resolvable:$true] %s33_s21 }
   0xe   :  { %s43_s23 = sshll.u32 %s1873_s2, 4  ;;  %s1214_s24 = scalar_lea.vmem %s34_s21, 16  ;;  %s44_s23 = int_to_ptr.vmem [resolvable:$true] %s43_s23 }
   0xf   :  { %p1215_p0 = scmp.ne.s32.totalorder %s34_s21, %s1214_s24  ;;  %p1219_p1 = scmp.lt.s32.totalorder %s34_s21, %s34_s21 }
  0x10   :  { %p1220_p2 = scmp.lt.s32.totalorder %s1214_s24, %s1214_s24 }
  0x12   :  { %p1221_p3 = por %p1220_p2, %p1219_p1 }
  0x14   :  { %p1222_p4 = pnand %p1221_p3, %p1215_p0 }
  0x16   :  { %1225 = shalt.err (!%p1222_p4)
}
  0x17   :  { %s1288_s25 = smov [#allocation5]   ;;  %s1226_s3 = scalar_lea.vmem %s44_s23, 16 }
  0x18   :  { %36 = dma.vmem_to_smem %s34_s21, 16, %s1288_s25, [#allocation7]  }
  0x19   :  { %p1227_p5 = scmp.ne.s32.totalorder %s44_s23, %s1226_s3  ;;  %p1231_p6 = scmp.lt.s32.totalorder %s44_s23, %s44_s23 }
  0x1a   :  { %p1232_p7 = scmp.lt.s32.totalorder %s1226_s3, %s1226_s3 }
  0x1c   :  { %p1233_p8 = por %p1232_p7, %p1231_p6 }
  0x1e   :  { %p1234_p9 = pnand %p1233_p8, %p1227_p5 }
  0x20   :  { %1237 = shalt.err (!%p1234_p9)
}
  0x21   :  { %s1289_s26 = smov [#allocation8]  }
  0x22   :  { %46 = dma.vmem_to_smem %s44_s23, 16, %s1289_s26, [#allocation9]  }
  0x23   :  { %1270 = dma.done.wait [#allocation7], 16  }
  0x24   :  { %1271 = vsyncadd [#allocation7], 4294967280 }
  0x25   :  { %1272 = dma.done.wait [#allocation9], 16  }
  0x26   :  { %1273 = vsyncadd [#allocation9], 4294967280 }
  0x27   :  { %87 = sfence }
  0x28   :  { %v1413_v0 = vld [vmem:[%s1851_s6] sm:$0xff]  ;;  %v1418_v1 = vld [vmem:[%s1851_s6 + $0x8] sm:$0xff]  ;;  %vm117_vm0 = vcmask 261120   ;;  %v134_v3 = vlaneseq  ;;  %v1433_v5 = vld [vmem:[%s1852_s7 + $0x10] sm:$0xff]  ;;  %v1866_v7 = vmov 0.0   ;;  %s1881_s30 = sld [smem:[#allocation26_spill]] }
  0x29   :  { %1874 = vst [vmem:[#allocation14_spill] sm:$0xff] %v1413_v0  ;;  %1875 = vst [vmem:[#allocation15_spill] sm:$0xff] %v1418_v1  ;;  %v1423_v2 = vld [vmem:[%s1852_s7] sm:$0xff]  ;;  %v1428_v4 = vld [vmem:[%s1852_s7 + $0x8] sm:$0xff]  ;;  %s1609_s28 = smov 0  }
  0x2a   :  { %1876 = vst [vmem:[#allocation16_spill] sm:$0xff] %v1423_v2  ;;  %1877 = vst [vmem:[#allocation17_spill] sm:$0xff] %v1428_v4  ;;  %v1438_v6 = vld [vmem:[%s1852_s7 + $0x18] sm:$0xff]  ;;  %v1475_v8 = vld [vmem:[%s1853_s8] sm:$0x1]  ;;  %v1487_v11 = vshrl.u32 %v134_v3, 7 }
  0x2b   :  { %1878 = vst [vmem:[#allocation18_spill] sm:$0xff] %v1433_v5  ;;  %1879 = vst [vmem:[#allocation19_spill] sm:$0xff] %v1438_v6  ;;  %v1480_v9 = vld [vmem:[%s1854_s9] sm:$0xff]  ;;  %v1485_v10 = vld [vmem:[%s1854_s9 + $0x8] sm:$0xff]  ;;  %v1489_v12 = vand.u32 127, %v134_v3 }
  0x2c   :  { %118 = vst.msk [vmem:[#allocation3] sm:$0xff] %vm117_vm0, %v1866_v7  ;;  %119 = vst.msk [vmem:[#allocation3 + $0x8] sm:$0xff] %vm117_vm0, %v1866_v7  ;;  %v1494_v13 = vld [vmem:[%s1855_s10] sm:$0xff]  ;;  %v1499_v14 = vld [vmem:[%s1855_s10 + $0x8] sm:$0xff] }
  0x2d   :  { %120 = vst.msk [vmem:[#allocation3 + $0x10] sm:$0xff] %vm117_vm0, %v1866_v7  ;;  %121 = vst.msk [vmem:[#allocation3 + $0x18] sm:$0xff] %vm117_vm0, %v1866_v7  ;;  %v1504_v15 = vld [vmem:[%s1855_s10 + $0x10] sm:$0xff]  ;;  %v1509_v16 = vld [vmem:[%s1855_s10 + $0x18] sm:$0xff]  ;;  %vm138_vm1 = vcmp.ge.s32.totalorder %v1489_v12, 64  ;;  %vm139_vm2 = vcmp.lt.s32.totalorder %v1489_v12, 96 }
  0x2e   :  { %122 = vst.msk [vmem:[#allocation3 + $0x20] sm:$0xff] %vm117_vm0, %v1866_v7  ;;  %123 = vst.msk [vmem:[#allocation3 + $0x28] sm:$0xff] %vm117_vm0, %v1866_v7  ;;  %v1514_v17 = vld [vmem:[%s1856_s11] ss:$0 sm:$0xff]  ;;  %v1524_v19 = vld [vmem:[%s1857_s12 + $0x8] sm:$0xff] }
  0x2f   :  { %124 = vst.msk [vmem:[#allocation3 + $0x30] sm:$0xff] %vm117_vm0, %v1866_v7  ;;  %125 = vst.msk [vmem:[#allocation3 + $0x38] sm:$0xff] %vm117_vm0, %v1866_v7  ;;  %v1519_v18 = vld [vmem:[%s1857_s12] sm:$0xff]  ;;  %v1534_v21 = vld [vmem:[%s1858_s13 + $0x8] sm:$0xff] }
  0x30   :  { %126 = vst.msk [vmem:[#allocation4] sm:$0xff] %vm117_vm0, %v1866_v7  ;;  %127 = vst.msk [vmem:[#allocation4 + $0x8] sm:$0xff] %vm117_vm0, %v1866_v7  ;;  %v1529_v20 = vld [vmem:[%s1858_s13] sm:$0xff]  ;;  %v1539_v22 = vld [vmem:[%s1858_s13 + $0x10] sm:$0xff] }
  0x31   :  { %128 = vst.msk [vmem:[#allocation4 + $0x10] sm:$0xff] %vm117_vm0, %v1866_v7  ;;  %129 = vst.msk [vmem:[#allocation4 + $0x18] sm:$0xff] %vm117_vm0, %v1866_v7  ;;  %v1544_v23 = vld [vmem:[%s1858_s13 + $0x18] sm:$0xff]  ;;  %v1549_v24 = vld [vmem:[%s1859_s14] ss:$0 sm:$0xff] }
  0x32   :  { %130 = vst.msk [vmem:[#allocation4 + $0x20] sm:$0xff] %vm117_vm0, %v1866_v7  ;;  %131 = vst.msk [vmem:[#allocation4 + $0x28] sm:$0xff] %vm117_vm0, %v1866_v7  ;;  %v1556_v25 = vld [vmem:[%s1881_s30] sm:$0xff]  ;;  %v1561_v26 = vld [vmem:[%s1881_s30 + $0x8] sm:$0xff] }
  0x33   :  { %132 = vst.msk [vmem:[#allocation4 + $0x30] sm:$0xff] %vm117_vm0, %v1866_v7  ;;  %133 = vst.msk [vmem:[#allocation4 + $0x38] sm:$0xff] %vm117_vm0, %v1866_v7  ;;  %v1566_v27 = vld [vmem:[%s1881_s30 + $0x10] sm:$0xff]  ;;  %v1571_v28 = vld [vmem:[%s1881_s30 + $0x18] sm:$0xff] }
  0x34   :  { %1880 = vst [vmem:[#allocation20_spill] sm:$0xff] %v1475_v8  ;;  %1882 = vst [vmem:[#allocation21_spill] sm:$0xff] %v1556_v25  ;;  %v1576_v29 = vld [vmem:[%s1881_s30 + $0x20] sm:$0xff]  ;;  %v1581_v30 = vld [vmem:[%s1881_s30 + $0x28] sm:$0xff] }
  0x35   :  { %1883 = vst [vmem:[#allocation22_spill] sm:$0xff] %v1561_v26  ;;  %1884 = vst [vmem:[#allocation23_spill] sm:$0xff] %v1566_v27  ;;  %v1586_v31 = vld [vmem:[%s1881_s30 + $0x30] sm:$0xff]  ;;  %v1591_v32 = vld [vmem:[%s1881_s30 + $0x38] sm:$0xff] }
  0x36   :  { %vm1595_vm3 = vmand %vm138_vm1, %vm139_vm2  ;;  %v141_v34 = vld [vmem:[%s1862_s17] sm:$0x1]  }
  0x37   :  { %v142_v35 = vld [vmem:[%s1863_s18] sm:$0x1]  }
  0x38 LB: > { %v1291_v36 = vmov 0.0   ;;  %v1887_v6 = vld [vmem:[#allocation19_spill] sm:$0xff]  ;;  %s1889_s12 = sld [smem:[#allocation27_spill]]  ;;  %v308_v37 = vstv %s1286_s28  ;;  %vm226_vm4 = vcmask 130048   ;;  %v1890_v5 = vld [vmem:[#allocation18_spill] sm:$0xff]  ;;  %vm1292_vm7 = vmmov 0   ;;  %s1286_s28 = sphi %s1609_s28, %s148_s28   ;;  %v1282_v34 = vphi %v141_v34, %v1753_v34   ;;  %v1278_v35 = vphi %v142_v35, %v908_v35  }
  0x39   : > { %1075 = vmatprep.subr.mxu0 %v1291_v36  ;;  %1086 = vmatprep.subr.mxu1 %v1291_v36  ;;  %v1888_v1 = vld [vmem:[#allocation15_spill] sm:$0xff]  ;;  %s1626_s8 = sld [smem:[#allocation8 + %s1286_s28]]  ;;  %v1891_v0 = vld [vmem:[#allocation14_spill] sm:$0xff]  ;;  %v1894_v4 = vld [vmem:[#allocation17_spill] sm:$0xff]  ;;  %v1293_v39 = vmov 0   ;;  %vm312_vm8 = vcmp.le.s32.totalorder %v1571_v28, %v308_v37  ;;  %vm314_vm10 = vcmp.le.s32.totalorder %v1581_v30, %v308_v37  ;;  %vm313_vm11 = vcmp.le.s32.totalorder %v1576_v29, %v308_v37  ;;  %s1294_s0 = smov 96  }
  0x3a   : > { %1076 = vmatpush3.msra.mxu0 %v1887_v6  ;;  %1087 = vmatpush3.msra.mxu1 %v1888_v1  ;;  %v1895_v2 = vld [vmem:[#allocation16_spill] sm:$0xff]  ;;  %v328_v42 = vsel %vm312_vm8, 1, %v1293_v39  ;;  %v330_v44 = vsel %vm314_vm10, 1, %v1293_v39  ;;  %v329_v45 = vsel %vm313_vm11, 1, %v1293_v39  ;;  %vm316_vm12 = vcmp.le.s32.totalorder %v1591_v32, %v308_v37  ;;  %s1295_s30 = smov 32   ;;  %s307_s20 = sld [smem:[#allocation5 + %s1286_s28]] }
  0x3b   : > { %1077 = vmatprep.subr.mxu0 %v1291_v36  ;;  %1088 = vmatprep.subr.mxu1 %v1291_v36  ;;  %v1893_v25 = vld [vmem:[#allocation21_spill] sm:$0xff]  ;;  %vm315_vm13 = vcmp.le.s32.totalorder %v1586_v31, %v308_v37  ;;  %v332_v46 = vsel %vm316_vm12, 1, %v1293_v39  ;;  %v1897_v8 = vld [vmem:[#allocation20_spill] sm:$0xff]  ;;  %s1296_s13 = smov 64   ;;  %vm540_vm11 = vcmask 253952   ;;  %s539_s21 = scalar_lea.vmem [#allocation2], %s1286_s28 }
  0x3c   : > { %1078 = vmatpush3.msra.mxu0 %v1890_v5  ;;  %1089 = vmatpush3.msra.mxu1 %v1891_v0  ;;  %v1892_v27 = vld [vmem:[#allocation23_spill] sm:$0xff]  ;;  %vm309_vm6 = vcmp.le.s32.totalorder %v1893_v25, %v308_v37  ;;  %v1896_v26 = vld [vmem:[#allocation22_spill] sm:$0xff]  ;;  %v331_v47 = vsel %vm315_vm13, 1, %v1293_v39  ;;  %v1698_v25 = vsub.s32 0, %v1487_v11 }
  0x3d   : > { %vm311_vm5 = vcmp.le.s32.totalorder %v1892_v27, %v308_v37  ;;  %1079 = vmatprep.subr.mxu0 %v1291_v36  ;;  %1090 = vmatprep.mubr.msk.f32.mxu1 %vm1292_vm7, %v1291_v36  ;;  %v325_v41 = vsel %vm309_vm6, 1, %v1293_v39  ;;  %vm310_vm9 = vcmp.le.s32.totalorder %v1896_v26, %v308_v37 }
  0x3e   : > { %s151_s29 = scalar_lea.vmem %s1889_s12, %s1286_s28  ;;  %1080 = vmatpush3.msra.mxu0 %v1894_v4  ;;  %1083 = vmatprep.mubr.msk.f32.mxu0 %vm1292_vm7, %v1291_v36  ;;  %v327_v40 = vsel %vm311_vm5, 1, %v1293_v39  ;;  %v326_v43 = vsel %vm310_vm9, 1, %v1293_v39 }
  0x3f   : > { %v152_v38 = vld [vmem:[%s151_s29] sm:$0x1]  ;;  %1081 = vmatprep.subr.mxu0 %v1291_v36  ;;  %1181 = vset.pattern.permute.xlu1 %v1293_v39  ;;  %p1036_p11 = scmp.le.s32.totalorder %s1626_s8, 0 }
  0x40   : > { %1091 = vmatmul.mubr.msk.f32.vlgmr.msra.gmra.mxu1 %vm226_vm4, %v152_v38  ;;  %1082 = vmatpush3.msra.mxu0 %v1895_v2  ;;  %v375_v38 = vld [vmem:[#allocation4 + $0x10] sm:$0xff]  ;;  %p520_p10 = scmp.gt.s32.totalorder %s307_s20, 0  ;;  %s1759_s14 = sshll.u32 (!%p1036_p11), %s1286_s28, 3 }
  0x41   : > { %1084 = vmatmul.mubr.msk.f32.vlgmr.msra.gmra.mxu0 %vm117_vm0, %v1282_v34  ;;  %1180 = vset.pattern.permute.xlu0 %v1293_v39  ;;  %v373_v39 = vld [vmem:[#allocation4] sm:$0xff]  ;;  %s548_s2 = scalar_lea.vmem (!%p1036_p11), %s1849_s4, %s1759_s14  ;;  %s1299_s23 = smov (!%p1036_p11), 64  }
  0x42   : > { %340 = vperm.xlu1 %1181, %v327_v40   ;;  %334 = vperm.xlu0 %1180, %v325_v41   ;;  %v376_v40 = vld [vmem:[#allocation4 + $0x18] sm:$0xff]  ;;  %v374_v41 = vld [vmem:[#allocation4 + $0x8] sm:$0xff]  ;;  %s521_s9 = scalar_select %p520_p10, 1, 0 }
  0x43   : > { %s550_s24 = scalar_lea.vmem (!%p1036_p11), %s1850_s5, %s1759_s14  ;;  %s1300_s25 = smov (!%p1036_p11), 32  }
  0x44   : > { %s1301_s10 = smov (!%p1036_p11), 96   ;;  %s890_s3 = scalar_lea.vmem (!%p1036_p11), [#allocation3], %s1759_s14 }
  0x45   : > { %s902_s11 = scalar_lea.vmem (!%p1036_p11), [#allocation4], %s1759_s14 }
  0x46   : > { %343 = vperm.xlu1 %1181, %v328_v42   ;;  %337 = vperm.xlu0 %1180, %v326_v43   ;;  %v378_v42 = vld [vmem:[#allocation4 + $0x28] sm:$0xff]  ;;  %v377_v43 = vld [vmem:[#allocation4 + $0x20] sm:$0xff] }
  0x4a   : > { %349 = vperm.xlu1 %1181, %v330_v44   ;;  %346 = vperm.xlu0 %1180, %v329_v45   ;;  %v380_v44 = vld [vmem:[#allocation4 + $0x38] sm:$0xff]  ;;  %v379_v45 = vld [vmem:[#allocation4 + $0x30] sm:$0xff] }
  0x4e   : > { %355 = vperm.xlu1 %1181, %v332_v46   ;;  %352 = vperm.xlu0 %1180, %v331_v47  }
  0xbd   : > { %v1649_v60 = vpop.permute.xlu1 %340  ;;  %v1651_v61 = vpop.permute.xlu0 %334 }
  0xbe   : > { %vm359_vm14 = vcmp.eq.s32.totalorder %v1649_v60, 1  ;;  %vm357_vm15 = vcmp.eq.s32.totalorder %v1651_v61, 1 }
  0xbf   : > { %v383_v46 = vsel %vm359_vm14, %v375_v38, -1e+30  ;;  %v381_v47 = vsel %vm357_vm15, %v373_v39, -1e+30 }
  0xc1   : > { %v1653_v62 = vpop.permute.xlu1 %343  ;;  %v1655_v63 = vpop.permute.xlu0 %337 }
  0xc2   : > { %vm360_vm2 = vcmp.eq.s32.totalorder %v1653_v62, 1  ;;  %vm358_vm5 = vcmp.eq.s32.totalorder %v1655_v63, 1 }
  0xc5   : > { %v1657_v3 = vpop.permute.xlu1 %349  ;;  %v1659_v34 = vpop.permute.xlu0 %346 }
  0xc6   : > { %vm362_vm6 = vcmp.eq.s32.totalorder %v1657_v3, 1  ;;  %vm361_vm7 = vcmp.eq.s32.totalorder %v1659_v34, 1 }
  0xc9   : > { %v1661_v36 = vpop.permute.xlu1 %355  ;;  %v1663_v37 = vpop.permute.xlu0 %352 }
  0xca   : > { %vm364_vm8 = vcmp.eq.s32.totalorder %v1661_v36, 1  ;;  %vm363_vm9 = vcmp.eq.s32.totalorder %v1663_v37, 1 }
 0x100   : > { %v296_v48 = vpop.f32.mrf.mxu1 }
 0x101   : > { %v222_v50 = vpop.f32.mrf.mxu0 }
 0x102   : > { %v1092_v49 = vpop.f32.mrf.mxu1  ;;  %v297_v51 = vadd.f32 %v296_v48, %v222_v50  ;;  %v384_v48 = vsel %vm360_vm2, %v376_v40, -1e+30  ;;  %v386_v50 = vsel %vm362_vm6, %v378_v42, -1e+30 }
 0x103   : > { %v1085_v52 = vpop.f32.mrf.mxu0  ;;  %v382_v49 = vsel %vm358_vm5, %v374_v41, -1e+30 }
 0x104   : > { %v300_v53 = vadd.f32 %v297_v51, %v1897_v8  ;;  %v385_v51 = vsel %vm361_vm7, %v377_v43, -1e+30  ;;  %v388_v52 = vsel %vm364_vm8, %v380_v44, -1e+30 }
 0x105   : > { %v393_v38 = vsel %vm117_vm0, %v385_v51, -inf  ;;  %v399_v39 = vsel %vm117_vm0, %v388_v52, -inf }
 0x106   : > { %v302_v54 = vmul.f32 0.5, %v300_v53 }
 0x108   : > { %1182 = vtanh.f32 %v302_v54  ;;  %v391_v54 = vsel %vm117_vm0, %v383_v46, -inf }
 0x109   : > { %1184 = vtanh.f32 %v300_v53  ;;  %v387_v53 = vsel %vm363_vm9, %v379_v45, -1e+30 }
 0x10a   : > { %v397_v40 = vsel %vm117_vm0, %v387_v53, -inf }
 0x10b   : > { %v398_v44 = vmax.f32 %v391_v54, %v397_v40 }
 0x115   : > { %v1183_v55 = vpop.eup %1182 }
 0x116   : > { %v304_v56 = vadd.f32 1.0, %v1183_v55  ;;  %v1185_v58 = vpop.eup %1184  ;;  %v389_v55 = vsel %vm117_vm0, %v381_v47, -inf }
 0x117   : > { %v394_v42 = vmax.f32 %v389_v55, %v393_v38 }
 0x118   : > { %v305_v57 = vmul.f32 0.5, %v304_v56  ;;  %v392_v56 = vsel %vm117_vm0, %v384_v48, -inf }
 0x119   : > { %v400_v43 = vmax.f32 %v392_v56, %v399_v39 }
 0x11a   : > { %v1645_v59 = vsel %vm1595_vm3, %v1185_v58, %v305_v57  ;;  %v390_v57 = vsel %vm117_vm0, %v382_v49, -inf  ;;  %v395_v58 = vsel %vm117_vm0, %v386_v50, -inf }
 0x11b   : > { %411 = vrot.lane.b32.xlu0 %v1645_v59, %s1294_s0  ;;  %v396_v41 = vmax.f32 %v390_v57, %v395_v58  ;;  %v402_v7 = vmax.f32 %v398_v44, %v400_v43 }
 0x11d   : > { %v401_v45 = vmax.f32 %v394_v42, %v396_v41 }
 0x11f   : > { %v403_v0 = vmax.f32 %v401_v45, %v402_v7 }
 0x121   : > { %v404_v1 = vrot.slane %v403_v0, 4 }
 0x123   : > { %v405_v2 = vmax.f32 %v403_v0, %v404_v1 }
 0x125   : > { %v406_v4 = vrot.slane %v405_v2, 2 }
 0x127   : > { %v407_v5 = vmax.f32 %v405_v2, %v406_v4 }
 0x129   : > { %v408_v6 = vrot.slane %v407_v5, 1 }
 0x12b   : > { %v409_v8 = vmax.f32 %v407_v5, %v408_v6 }
 0x18d   : > { %v1700_v26 = vpop.permute.xlu0 %411 }
 0x18e   : > { %v414_v27 = vmax.f32 %v409_v8, %v1700_v26  ;;  %v514_v55 = vmul.f32 %v1700_v26, %v1645_v59 }
 0x190   : > { %v425_v54 = vrot.slane %v414_v27, %v1698_v25  ;;  %516 = vrot.lane.b32.xlu1 %v514_v55, %s1294_s0  ;;  %416 = vrot.lane.b32.xlu0 %v414_v27, %s1295_s30 }
 0x192   : > { %v426_v0 = vsub.f32 %v381_v47, %v425_v54  ;;  %v427_v1 = vsub.f32 %v382_v49, %v425_v54  ;;  %v428_v2 = vsub.f32 %v383_v46, %v425_v54  ;;  %v429_v4 = vsub.f32 %v384_v48, %v425_v54  ;;  %v319_v46 = vld [vmem:[#allocation3 + $0x10] sm:$0xff]  ;;  %v317_v47 = vld [vmem:[#allocation3] sm:$0xff]  ;;  %v320_v48 = vld [vmem:[#allocation3 + $0x18] sm:$0xff] }
 0x193   : > { %v430_v5 = vsub.f32 %v385_v51, %v425_v54  ;;  %v431_v6 = vsub.f32 %v386_v50, %v425_v54  ;;  %v432_v8 = vsub.f32 %v387_v53, %v425_v54  ;;  %v433_v39 = vsub.f32 %v388_v52, %v425_v54  ;;  %v318_v49 = vld [vmem:[#allocation3 + $0x8] sm:$0xff] }
 0x194   : > { %v434_v7 = vmul.f32 1.442695, %v426_v0  ;;  %v436_v56 = vmul.f32 1.442695, %v427_v1  ;;  %v438_v57 = vmul.f32 1.442695, %v428_v2 }
 0x195   : > { %v440_v58 = vmul.f32 1.442695, %v429_v4  ;;  %v442_v38 = vmul.f32 1.442695, %v430_v5  ;;  %v444_v40 = vmul.f32 1.442695, %v431_v6 }
 0x196   : > { %1186 = vpow2.f32 %v434_v7  ;;  %v446_v41 = vmul.f32 1.442695, %v432_v8  ;;  %v448_v27 = vmul.f32 1.442695, %v433_v39  ;;  %v367_v51 = vsel %vm359_vm14, %v319_v46, 0.0  ;;  %v322_v54 = vld [vmem:[#allocation3 + $0x28] sm:$0xff] }
 0x197   : > { %1188 = vpow2.f32 %v436_v56  ;;  %v365_v52 = vsel %vm357_vm15, %v317_v47, 0.0  ;;  %v368_v42 = vsel %vm360_vm2, %v320_v48, 0.0  ;;  %v366_v43 = vsel %vm358_vm5, %v318_v49, 0.0  ;;  %v321_v0 = vld [vmem:[#allocation3 + $0x20] sm:$0xff]  ;;  %v324_v39 = vld [vmem:[#allocation3 + $0x38] sm:$0xff] }
 0x198   : > { %1190 = vpow2.f32 %v438_v57  ;;  %v370_v57 = vsel %vm362_vm6, %v322_v54, 0.0  ;;  %v369_v8 = vsel %vm361_vm7, %v321_v0, 0.0  ;;  %v372_v34 = vsel %vm364_vm8, %v324_v39, 0.0 }
 0x199   : > { %1192 = vpow2.f32 %v440_v58 }
 0x19a   : > { %1194 = vpow2.f32 %v442_v38 }
 0x19b   : > { %1196 = vpow2.f32 %v444_v40  ;;  %v323_v40 = vld [vmem:[#allocation3 + $0x30] sm:$0xff] }
 0x19c   : > { %1198 = vpow2.f32 %v446_v41 }
 0x19d   : > { %1200 = vpow2.f32 %v448_v27 }
 0x1a3   : > { %v1187_v50 = vpop.eup %1186 }
 0x1a4   : > { %v1189_v53 = vpop.eup %1188  ;;  %v485_v44 = vsel %vm117_vm0, %v1187_v50, 0.0  ;;  %v451_v45 = vmul.f32 %v1187_v50, %v365_v52 }
 0x1a5   : > { %v1191_v55 = vpop.eup %1190  ;;  %v486_v1 = vsel %vm117_vm0, %v1189_v53, 0.0  ;;  %v452_v60 = vmul.f32 %v1189_v53, %v366_v43  ;;  %v371_v53 = vsel %vm363_vm9, %v323_v40, 0.0 }
 0x1a6   : > { %v1193_v2 = vpop.eup %1192  ;;  %v487_v4 = vadd.f32 %v486_v1, %v485_v44  ;;  %v453_v61 = vmul.f32 %v1191_v55, %v367_v51  ;;  %v459_v5 = vsel %vm117_vm0, %v451_v45, 0.0  ;;  %v488_v62 = vsel %vm117_vm0, %v1191_v55, 0.0 }
 0x1a7   : > { %v1195_v6 = vpop.eup %1194  ;;  %v454_v7 = vmul.f32 %v1193_v2, %v368_v42  ;;  %v460_v63 = vsel %vm117_vm0, %v452_v60, 0.0  ;;  %v490_v41 = vsel %vm117_vm0, %v1193_v2, 0.0 }
 0x1a8   : > { %v1197_v56 = vpop.eup %1196  ;;  %v489_v58 = vadd.f32 %v488_v62, %v487_v4  ;;  %v461_v38 = vadd.f32 %v460_v63, %v459_v5  ;;  %v455_v27 = vmul.f32 %v1195_v6, %v369_v8  ;;  %v462_v46 = vsel %vm117_vm0, %v453_v61, 0.0 }
 0x1a9   : > { %v1199_v47 = vpop.eup %1198  ;;  %v492_v50 = vsel %vm117_vm0, %v1195_v6, 0.0  ;;  %v456_v51 = vmul.f32 %v1197_v56, %v370_v57  ;;  %v464_v3 = vsel %vm117_vm0, %v454_v7, 0.0  ;;  %v494_v44 = vsel %vm117_vm0, %v1197_v56, 0.0 }
 0x1aa   : > { %v491_v48 = vadd.f32 %v490_v41, %v489_v58  ;;  %v463_v49 = vadd.f32 %v462_v46, %v461_v38  ;;  %v1201_v52 = vpop.eup %1200  ;;  %v457_v45 = vmul.f32 %v1199_v47, %v371_v53  ;;  %v466_v55 = vsel %vm117_vm0, %v455_v27, 0.0 }
 0x1ab   : > { %v496_v1 = vsel %vm117_vm0, %v1199_v47, 0.0  ;;  %v458_v60 = vmul.f32 %v1201_v52, %v372_v34  ;;  %v468_v2 = vsel %vm117_vm0, %v456_v51, 0.0  ;;  %v498_v61 = vsel %vm117_vm0, %v1201_v52, 0.0 }
 0x1ac   : > { %v493_v42 = vadd.f32 %v492_v50, %v491_v48  ;;  %v465_v43 = vadd.f32 %v464_v3, %v463_v49  ;;  %v470_v37 = vsel %vm117_vm0, %v457_v45, 0.0  ;;  %v513_v48 = vmul.f32 %v1278_v35, %v1645_v59 }
 0x1ad   : > { %v472_v62 = vsel %vm117_vm0, %v458_v60, 0.0  ;;  %v522_v35 = vstv %s521_s9 }
 0x1ae   : > { %v495_v54 = vadd.f32 %v494_v44, %v493_v42  ;;  %v467_v0 = vadd.f32 %v466_v55, %v465_v43  ;;  %vm523_vm10 = vcmp.eq.s32.totalorder %v522_v35, 1 }
 0x1b0   : > { %v497_v4 = vadd.f32 %v496_v1, %v495_v54  ;;  %v469_v36 = vadd.f32 %v468_v2, %v467_v0 }
 0x1b2   : > { %v499_v5 = vadd.f32 %v498_v61, %v497_v4  ;;  %v471_v6 = vadd.f32 %v470_v37, %v469_v36 }
 0x1b4   : > { %v500_v7 = vrot.slane %v499_v5, 4  ;;  %v473_v63 = vadd.f32 %v472_v62, %v471_v6 }
 0x1b6   : > { %v501_v56 = vadd.f32 %v500_v7, %v499_v5  ;;  %v474_v57 = vrot.slane %v473_v63, 4 }
 0x1b8   : > { %v502_v8 = vrot.slane %v501_v56, 2  ;;  %v475_v58 = vadd.f32 %v474_v57, %v473_v63 }
 0x1ba   : > { %v503_v38 = vadd.f32 %v502_v8, %v501_v56  ;;  %v476_v39 = vrot.slane %v475_v58, 2 }
 0x1bc   : > { %v504_v40 = vrot.slane %v503_v38, 1  ;;  %v477_v41 = vadd.f32 %v476_v39, %v475_v58 }
 0x1be   : > { %v505_v27 = vadd.f32 %v504_v40, %v503_v38  ;;  %v478_v46 = vrot.slane %v477_v41, 1 }
 0x1c0   : > { %507 = vrot.lane.b32.xlu1 %v505_v27, %s1295_s30  ;;  %v479_v47 = vadd.f32 %v478_v46, %v477_v41 }
 0x1c2   : > { %481 = vrot.lane.b32.xlu0 %v479_v47, %s1295_s30 }
 0x202   : > { %v517_v49 = vpop.permute.xlu1 %516  ;;  %v417_v51 = vpop.permute.xlu0 %416 }
 0x203   : > { %v519_v50 = vadd.f32 %v517_v49, %v513_v48  ;;  %v419_v3 = vsub.f32 %v1645_v59, %v417_v51 }
 0x205   : > { %525 = vrot.lane.b32.xlu1 %v519_v50, %s1295_s30  ;;  %v420_v52 = vmul.f32 1.442695, %v419_v3 }
 0x207   : > { %1202 = vpow2.f32 %v420_v52 }
 0x214   : > { %v1203_v53 = vpop.eup %1202 }
 0x215   : > { %v450_v44 = vmul.f32 %v1203_v53, %v1700_v26 }
 0x232   : > { %v508_v34 = vpop.permute.xlu1 %507 }
 0x233   : > { %v510_v42 = vadd.f32 %v1203_v53, %v508_v34 }
 0x234   : > { %v482_v43 = vpop.permute.xlu0 %481 }
 0x235   : > { %1204 = vrcp.f32 %v510_v42  ;;  %v484_v55 = vadd.f32 %v482_v43, %v450_v44 }
 0x242   : > { %v1205_v45 = vpop.eup %1204 }
 0x243   : > { %v512_v54 = vmul.f32 %v1205_v45, %v484_v55 }
 0x277   : > { %v526_v0 = vpop.permute.xlu1 %525 }
 0x278   : > { %v1748_v1 = vsel %vm523_vm10, %v512_v54, %v526_v0 }
 0x279   : > { %1206 = vtanh.f32 %v1748_v1 }
 0x286   : > { %v1207_v60 = vpop.eup %1206 }
 0x287   : > { %531 = vrot.lane.b32.xlu0 %v1207_v60, %s1296_s13 }
 0x2f9   : > { %v532_v2 = vpop.permute.xlu0 %531 }
 0x2fa   : > { %v534_v4 = vmul.f32 %v532_v2, %v1645_v59 }
 0x2fc   : > { %536 = vrot.lane.b32.xlu1 %v534_v4, %s1295_s30 }
 0x36b   : > { %546 = sbr.rel (%p1036_p11) target bundleno = 1677 (0x68d), region = 96 }
 0x36e   : > { %v1753_v34 = vpop.permute.xlu1 %536  }
 0x36f   : > { %541 = vst.msk [vmem:[%s539_s21] sm:$0x1] %vm540_vm11, %v1753_v34 }
 0x370   : > { %v1297_v26 = vmov 0.0   ;;  %vm1298_vm12 = vmmov 0   ;;  %v549_v59 = vld [vmem:[%s548_s2] sm:$0xff]  ;;  %v717_v27 = vrot.slane %v1748_v1, %v1698_v25  ;;  %v888_v3 = vstv %s1626_s8 }
 0x371   : > { %1093 = vmatprep.subr.mxu0 %v1297_v26  ;;  %1104 = vmatprep.subr.mxu1 %v1297_v26  ;;  %v551_v39 = vld [vmem:[%s550_s24] sm:$0xff] }
 0x372   : > { %1094 = vmatpush3.msra.mxu0 %v1509_v16  ;;  %1105 = vmatpush3.msra.mxu1 %v1485_v10  ;;  %v891_v49 = vld [vmem:[%s890_s3] sm:$0xff] }
 0x373   : > { %1095 = vmatprep.subr.mxu0 %v1297_v26  ;;  %1106 = vmatprep.subr.mxu1 %v1297_v26  ;;  %v903_v2 = vld [vmem:[%s902_s11] sm:$0xff] }
 0x374   : > { %1096 = vmatpush3.msra.mxu0 %v1504_v15  ;;  %1101 = vmatprep.mubr.msk.f32.mxu0 %vm1298_vm12, %v1297_v26 }
 0x375   : > { %1097 = vmatprep.subr.mxu0 %v1297_v26  ;;  %1107 = vmatpush3.msra.mxu1 %v1480_v9 }
 0x376   : > { %1098 = vmatpush3.msra.mxu0 %v1499_v14  ;;  %1108 = vmatprep.mubr.msk.f32.mxu1 %vm1298_vm12, %v1297_v26 }
 0x377   : > { %1099 = vmatprep.subr.mxu0 %v1297_v26  ;;  %1109 = vmatmul.mubr.msk.f32.vlgmr.msra.gmra.mxu1 %vm226_vm4, %v549_v59 }
 0x378   : > { %1100 = vmatpush3.msra.mxu0 %v1494_v13  ;;  %1111 = vmatprep.subr.mxu1 %v1297_v26 }
 0x379   : > { %1102 = vmatmul.mubr.msk.f32.vlgmr.msra.gmra.mxu0 %vm117_vm0, %v1753_v34  ;;  %1112 = vmatpush3.msra.mxu1 %v1544_v23 }
 0x37a   : > { %1113 = vmatprep.subr.mxu1 %v1297_v26  ;;  %1122 = vmatprep.subr.mxu0 %v1297_v26 }
 0x37b   : > { %1114 = vmatpush3.msra.mxu1 %v1539_v22  ;;  %1123 = vmatpush3.msra.mxu0 %v1524_v19 }
 0x37c   : > { %1115 = vmatprep.subr.mxu1 %v1297_v26  ;;  %1124 = vmatprep.subr.mxu0 %v1297_v26 }
 0x37d   : > { %1116 = vmatpush3.msra.mxu1 %v1534_v21  ;;  %1125 = vmatpush3.msra.mxu0 %v1519_v18 }
 0x37e   : > { %1126 = vmatprep.mubr.msk.f32.mxu0 %vm1298_vm12, %v1297_v26  ;;  %1117 = vmatprep.subr.mxu1 %v1297_v26 }
 0x37f   : > { %1118 = vmatpush3.msra.mxu1 %v1529_v20  ;;  %1119 = vmatprep.mubr.msk.f32.mxu1 %vm1298_vm12, %v1297_v26 }
 0x380   : > { %1127 = vmatmul.mubr.msk.f32.vlgmr.msra.gmra.mxu0 %vm226_vm4, %v551_v39  ;;  %vm1799_vm4 = vcmp.lt.s32.totalorder %v1487_v11, %v888_v3 }
 0x437   : > { %v697_v36 = vpop.f32.mrf.mxu1 }
 0x439   : > { %v620_v61 = vpop.f32.mrf.mxu0  ;;  %v1110_v37 = vpop.f32.mrf.mxu1 }
 0x43a   : > { %v627_v5 = vrot.slane %v620_v61, %v1698_v25 }
 0x43b   : > { %v1103_v6 = vpop.f32.mrf.mxu0 }
 0x43c   : > { %v698_v62 = vadd.f32 %v697_v36, %v627_v5 }
 0x43e   : > { %v707_v7 = vadd.f32 %v1514_v17, %v698_v62 }
 0x440   : > { %v709_v63 = vmul.f32 0.5, %v707_v7  ;;  %v873_v50 = vpop.f32.mrf.mxu0 }
 0x442   : > { %1208 = vtanh.f32 %v709_v63  ;;  %v1128_v51 = vpop.f32.mrf.mxu0 }
 0x443   : > { %1210 = vtanh.f32 %v707_v7 }
 0x44f   : > { %v1209_v56 = vpop.eup %1208 }
 0x450   : > { %v711_v57 = vadd.f32 1.0, %v1209_v56  ;;  %v1211_v58 = vpop.eup %1210 }
 0x452   : > { %v712_v8 = vmul.f32 0.5, %v711_v57 }
 0x454   : > { %v713_v38 = vsel %vm138_vm1, %v1211_v58, %v712_v8 }
 0x455   : > { %720 = vrot.lane.b32.xlu0 %v713_v38, %s1299_s23  ;;  %v718_v46 = vmul.f32 %v717_v27, %v713_v38 }
 0x4c7   : > { %v721_v40 = vpop.permute.xlu0 %720 }
 0x4c8   : > { %v723_v41 = vmul.f32 %v721_v40, %v713_v38 }
 0x4ca   : > { %725 = vrot.lane.b32.xlu0 %v723_v41, %s1300_s25 }
 0x53c   : > { %v726_v47 = vpop.permute.xlu0 %725 }
 0x53d   : > { %v728_v48 = vadd.f32 %v726_v47, %v718_v46 }
 0x53f   : > { %730 = vrot.lane.b32.xlu1 %v728_v48, %s1301_s10 }
 0x543   : > { %893 = vrot.lane.b32.xlu1 %v891_v49, %s1300_s25 }
 0x5b1   : > { %v731_v52 = vpop.permute.xlu1 %730 }
 0x5b2   : > { %1120 = vmatmul.mubr.msk.f32.vlgmr.msra.gmra.mxu1 %vm117_vm0, %v731_v52 }
 0x5b5   : > { %v894_v25 = vpop.permute.xlu1 %893 }
 0x5b6   : > { %v896_v42 = vsel %vm1799_vm4, %v728_v48, %v894_v25 }
 0x5b7   : > { %898 = vrot.lane.b32.xlu0 %v896_v42, %s1301_s10 }
 0x629   : > { %v899_v43 = vpop.permute.xlu0 %898 }
 0x62a   : > { %901 = vst.msk [vmem:[%s890_s3] sm:$0xff] %vm117_vm0, %v899_v43 }
 0x672   : > { %v800_v44 = vpop.f32.mrf.mxu1 }
 0x673   : > { %v874_v35 = vadd.f32 %v873_v50, %v800_v44 }
 0x674   : > { %v1121_v45 = vpop.f32.mrf.mxu1 }
 0x675   : > { %v883_v55 = vadd.f32 %v1549_v24, %v874_v35 }
 0x677   : > { %v884_v54 = vmul.f32 0.5, %v883_v55 }
 0x679   : > { %1212 = vtanh.f32 %v884_v54 }
 0x686   : > { %v1213_v0 = vpop.eup %1212 }
 0x687   : > { %v886_v60 = vadd.f32 1.0, %v1213_v0 }
 0x689   : > { %v887_v4 = vmul.f32 0.5, %v886_v60 }
 0x68b   : > { %v904_v26 = vsel %vm1799_vm4, %v887_v4, %v903_v2 }
 0x68c   : > { %905 = vst.msk [vmem:[%s902_s11] sm:$0xff] %vm117_vm0, %v904_v26 }
 0x68d PF: > { %907 = vrot.lane.b32.xlu0 %v1748_v1, %s1294_s0  ;;  %s148_s28 = sadd.s32 1, %s1286_s28  }
 0x68e   : > { %p145_p12 = scmp.ge.s32.totalorder %s148_s28, 8  }
 0x68f   :  { %v1900_v59 = vmov (%p145_p12), 0.0   ;;  %v914_v36 = vld [vmem:[%s1860_s15 + $0x18] sm:$0xff] (%p145_p12)  ;;  %v913_v1 = vld [vmem:[%s1860_s15 + $0x10] sm:$0xff] (%p145_p12)  ;;  %vm1302_vm13 = vmmov (%p145_p12), 0   ;;  %v912_v34 = vld [vmem:[%s1860_s15 + $0x8] sm:$0xff] (%p145_p12)  ;;  %s1303_s0 = smov (%p145_p12), [#allocation10]  }
 0x690   :  { %1129 = vmatprep.subr.mxu0 (%p145_p12), %v1900_v59  ;;  %1137 = vmatprep.mubr.msk.f32.mxu0 (%p145_p12), %vm1302_vm13, %v1900_v59  ;;  %v911_v9 = vld [vmem:[%s1860_s15] sm:$0xff] (%p145_p12)  ;;  %s1003_s30 = sshll.u32 (%p145_p12), %s1303_s0, 4  ;;  %vm995_vm1 = vcmask (%p145_p12), 39936   ;;  %s1004_s30 = int_to_ptr.vmem [resolvable:$true] %s1003_s30 }
 0x691   :  { %1130 = vmatpush3.msra.mxu0 (%p145_p12), %v914_v36  ;;  %v1044_v11 = vld [vmem:[%s1861_s16] ss:$0 sm:$0xff] (%p145_p12)  ;;  %s1238_s15 = scalar_lea.vmem (%p145_p12), %s1004_s30, 128  ;;  %p1243_p0 = scmp.lt.s32.totalorder (%p145_p12), %s1004_s30, %s1004_s30 }
 0x692   :  { %1131 = vmatprep.subr.mxu0 (%p145_p12), %v1900_v59  ;;  %p1239_p13 = scmp.ne.s32.totalorder (%p145_p12), %s1004_s30, %s1238_s15  ;;  %p1244_p1 = scmp.lt.s32.totalorder (%p145_p12), %s1238_s15, %s1238_s15 }
 0x693   :  { %1132 = vmatpush3.msra.mxu0 (%p145_p12), %v913_v1  ;;  %v910_v10 = vld [vmem:[#allocation2] sm:$0xff] (%p145_p12) }
 0x694   :  { %1133 = vmatprep.subr.mxu0 (%p145_p12), %v1900_v59  ;;  %p1245_p2 = por (%p145_p12), %p1244_p1, %p1243_p0 }
 0x695   :  { %1134 = vmatpush3.msra.mxu0 (%p145_p12), %v912_v34 }
 0x696   :  { %1135 = vmatprep.subr.mxu0 (%p145_p12), %v1900_v59  ;;  %p1246_p3 = pnand (%p145_p12), %p1245_p2, %p1239_p13 }
 0x697   :  { %1136 = vmatpush3.msra.mxu0 (%p145_p12), %v911_v9 }
 0x698   :  { %1138 = vmatmul.mubr.msk.f32.vlgmr.msra.gmra.mxu0 (%p145_p12), %vm117_vm0, %v910_v10 }
 0x6fb   :  { %147 = sbr.rel (!%p145_p12) target bundleno = 56 (0x38), region = 121 }
 0x6ff   : > { %v908_v35 = vpop.permute.xlu0 %907  }
 0x758   :  { %v991_v12 = vpop.f32.mrf.mxu0 }
 0x759   :  { %v992_v13 = vadd.f32 %v1044_v11, %v991_v12 }
 0x75a   :  { %v1139_v14 = vpop.f32.mrf.mxu0 }
 0x75b   :  { %996 = vst.msk [vmem:[#allocation10] sm:$0xff] %vm995_vm1, %v992_v13 }
 0x75c   :  { %1249 = shalt.err (!%p1246_p3)
}
 0x75d   :  { %1006 = dma.vmem_to_hbm [thread:$0]  %s1004_s30, 128, %s1864_s19, [#allocation6]  }
 0x75e   :  { %1274 = dma.done.wait [#allocation6], 128  }
 0x75f   :  { %1275 = vsyncadd [#allocation6], 4294967168 }
 0x760   :  { %1010 = vsyncpa [#allocation6], 1 }
 0x761   :  { %1011 = vsyncpa [#allocation7], 1 }
 0x762   :  { %1012 = vsyncpa [#allocation9], 1 }

</bundles_post_ra>
